<compile_context>
chip_gen: v7x
topology: tpu7x:2x2x1
jax: 0.10.0
libtpu: 0.0.40
codegen_flags: <defaults>
</compile_context>

<pallas_src>
import jax
import jax.numpy as jnp
from jax.experimental import pallas as pl
from jax.experimental.pallas import tpu as pltpu

EPS = 1e-5


def _round_up(x, m):
    return ((x + m - 1) // m) * m


def _tpu_params():
    """Generation-aware (vmem_capacity_bytes, channel_pad, num_tensorcores)."""
    kind = ""
    try:
        kind = jax.devices()[0].device_kind.lower()
    except Exception:
        pass
    if "v5 lite" in kind or "v5e" in kind or "v5lite" in kind:
        cap, pad, cores = 128 << 20, 128, 1    # v5e: 128 MiB VMEM, 4x128^2 MXU, 1 TC
    elif "v6" in kind:
        cap, pad, cores = 128 << 20, 256, 1    # v6e: 128 MiB VMEM, 2x256^2 MXU, 1 TC
    elif "v7" in kind:
        cap, pad, cores = 64 << 20, 256, 2     # v7x: 64 MiB VMEM, 2x256^2 MXU, 2 TC
    else:
        cap, pad, cores = 64 << 20, 128, 2     # unknown: conservative
    try:  # refine VMEM capacity if queryable on this build
        cap = int(pltpu.get_tpu_info().vmem_capacity_bytes)
    except Exception:
        pass
    return cap, pad, cores


def _choose_tiles(M, d_in_p, d_hid_p, itemsize, pad_h, vmem_cap, num_cores):
    """Pick (row tile tm, hidden slab th) from an honest VMEM footprint."""
    budget = vmem_cap // 2                     # leave half of VMEM as pipeline slack

    # Hidden-dim slab: bound resident weight bytes to ~1/3 of the budget.
    full_w = 2 * d_in_p * d_hid_p * itemsize   # W1 + W2, one copy each
    if 2 * full_w <= budget // 3:              # conservatively assume double-buffered
        th = d_hid_p                           # whole hidden dim resident, grid_h == 1
    else:
        per_col = 2 * 2 * d_in_p * itemsize    # 2 weights x 2 buffers per hidden col
        th = (budget // 3) // per_col
        th = max(pad_h, (th // pad_h) * pad_h)
        th = min(th, d_hid_p)
    weight_bytes = 2 * 2 * d_in_p * th * itemsize   # conservative (2 buffers)

    # Row tile: per-row live bytes (x/out double-buffered, f32 accumulator,
    # f32 hidden slab + its cast copy, extra live f32 epilogue temps).
    per_row = (4 * d_in_p * itemsize
               + 4 * d_in_p
               + (4 + itemsize) * th
               + 2 * 4 * d_in_p)
    small = 4 * itemsize * (2 * th + 4 * d_in_p)    # biases / gamma / beta / mask
    avail = max(budget - weight_bytes - small, 8 * per_row)
    tm = max(8, min(1024, avail // per_row))
    # Megacore: keep >= num_cores row tiles so the "parallel" M axis can shard.
    if num_cores > 1 and M > 8:
        tm = min(tm, _round_up(-(-M // num_cores), 8))
    tm = min(tm, _round_up(M, 8))
    tm = (tm // 256) * 256 if tm >= 256 else max(8, (tm // 8) * 8)
    return int(tm), int(th)


def _make_ffn_kernel(d_in, d_in_p, eps):
    inv_d = 1.0 / float(d_in)
    needs_mask = d_in_p != d_in

    def ffn_kernel(x_ref, w1_ref, b1_ref, w2_ref, b2_ref, g_ref, beta_ref,
                   mask_ref, o_ref, acc_ref):
        h_idx = pl.program_id(1)

        @pl.when(h_idx == 0)
        def _init():
            acc_ref[...] = jnp.zeros_like(acc_ref)

        # ---- FFN body for this hidden slab (MXU, f32 accumulation) ----
        x = x_ref[...]                                     # native dtype (bf16 fast path)
        h = jnp.dot(x, w1_ref[...], preferred_element_type=jnp.float32)
        h = jnp.maximum(h + b1_ref[...].astype(jnp.float32), 0.0)
        h = h.astype(w2_ref.dtype)
        acc_ref[...] += jnp.dot(h, w2_ref[...], preferred_element_type=jnp.float32)

        # ---- residual + LayerNorm epilogue, once per row tile ----
        @pl.when(h_idx == pl.num_programs(1) - 1)
        def _epilogue():
            # dropout is identity in eval mode.
            # TODO(synk): training-mode dropout (pltpu.prng_*) not implemented.
            y = acc_ref[...] + b2_ref[...].astype(jnp.float32)
            # Padded lanes of y and x are exactly 0 (wrapper zero-pads x, W2's
            # output cols and b2), so the mean over the real d_in lanes is exact.
            z = y + x.astype(jnp.float32)
            mean = jnp.sum(z, axis=-1, keepdims=True) * inv_d
            centered = z - mean
            if needs_mask:
                centered = centered * mask_ref[...]        # zero padded lanes (f32 mask)
            var = jnp.sum(centered * centered, axis=-1, keepdims=True) * inv_d
            norm = centered * jax.lax.rsqrt(var + eps)      # rsqrt -> EUP slot
            out = (norm * g_ref[...].astype(jnp.float32)
                   + beta_ref[...].astype(jnp.float32))
            o_ref[...] = out.astype(o_ref.dtype)

    return ffn_kernel


def positionwise_ffn(x, w1, b1, w2, b2, gamma, beta, *, eps=EPS, tm=None, th=None):
    """x: (B, L, d_in); w1: (d_in, d_hid); w2: (d_hid, d_in).

    For best MXU throughput (v5e/v6e/v7x) pass x / w1 / w2 as bfloat16;
    accumulation and the residual+LayerNorm epilogue stay in float32.
    """
    B, L, d_in = x.shape
    d_hid = w1.shape[1]
    M = B * L

    vmem_cap, pad_h, num_cores = _tpu_params()
    itemsize = jnp.dtype(x.dtype).itemsize

    # Lane-dense channel dims; 256-granular on v6e/v7x (2x256^2 MXU), 128 on v5e.
    d_in_p = _round_up(d_in, pad_h)
    d_hid_p = _round_up(d_hid, pad_h)

    auto_tm, auto_th = _choose_tiles(M, d_in_p, d_hid_p, itemsize, pad_h,
                                     vmem_cap, num_cores)
    tm = auto_tm if tm is None else max(8, (int(tm) // 8) * 8)
    th = auto_th if th is None else max(128, (int(th) // 128) * 128)
    th = min(th, d_hid_p)
    d_hid_p = _round_up(d_hid_p, th)           # make the hidden grid exact
    grid_h = d_hid_p // th

    M_p = _round_up(M, tm)
    grid_m = M_p // tm

    # Zero padding keeps the matmuls exact and the LN padded-lane invariant true.
    x2d = x.reshape(M, d_in)
    if (M_p, d_in_p) != (M, d_in):
        x2d = jnp.pad(x2d, ((0, M_p - M), (0, d_in_p - d_in)))
    w1_p = jnp.pad(w1, ((0, d_in_p - d_in), (0, d_hid_p - d_hid)))
    w2_p = jnp.pad(w2, ((0, d_hid_p - d_hid), (0, d_in_p - d_in)))
    b1_p = jnp.pad(b1, (0, d_hid_p - d_hid)).reshape(1, d_hid_p)
    b2_p = jnp.pad(b2, (0, d_in_p - d_in)).reshape(1, d_in_p)
    g_p = jnp.pad(gamma, (0, d_in_p - d_in)).reshape(1, d_in_p)
    be_p = jnp.pad(beta, (0, d_in_p - d_in)).reshape(1, d_in_p)
    mask = (jnp.arange(d_in_p) < d_in).astype(jnp.float32).reshape(1, d_in_p)

    kernel = _make_ffn_kernel(d_in, d_in_p, eps)
    out_shape = jax.ShapeDtypeStruct((M_p, d_in_p), x.dtype)
    vmem_limit = min(vmem_cap * 3 // 4, 112 * 1024 * 1024)

    def build_and_run(single_buffer_consts):
        const_mode = pl.Buffered(1) if single_buffer_consts else None
        # W1/b1/W2 block indices are constant over the whole grid only when
        # the hidden dim fits in one slab; otherwise keep them double-buffered
        # so the per-slab weight DMA overlaps the matmuls.
        w_mode = const_mode if grid_h == 1 else None

        def spec(shape, imap, mode=None):
            if mode is None:
                return pl.BlockSpec(shape, imap)
            return pl.BlockSpec(shape, imap, pipeline_mode=mode)

        grid_spec = pltpu.PrefetchScalarGridSpec(
            num_scalar_prefetch=0,
            grid=(grid_m, grid_h),
            in_specs=[
                spec((tm, d_in_p), lambda i, h: (i, 0)),             # x (resident over h)
                spec((d_in_p, th), lambda i, h: (0, h), w_mode),     # W1 slab
                spec((1, th), lambda i, h: (0, h), w_mode),          # b1 slab
                spec((th, d_in_p), lambda i, h: (h, 0), w_mode),     # W2 slab
                spec((1, d_in_p), lambda i, h: (0, 0), const_mode),  # b2
                spec((1, d_in_p), lambda i, h: (0, 0), const_mode),  # gamma
                spec((1, d_in_p), lambda i, h: (0, 0), const_mode),  # beta
                spec((1, d_in_p), lambda i, h: (0, 0), const_mode),  # lane mask
            ],
            out_specs=pl.BlockSpec((tm, d_in_p), lambda i, h: (i, 0)),
            scratch_shapes=[pltpu.VMEM((tm, d_in_p), jnp.float32)],  # f32 accumulator
        )
        return pl.pallas_call(
            kernel,
            out_shape=out_shape,
            grid_spec=grid_spec,
            compiler_params=pltpu.CompilerParams(
                dimension_semantics=("parallel", "arbitrary"),  # M across TCs, d_hid reduce
                vmem_limit_bytes=int(vmem_limit),
            ),
        )(x2d, w1_p, b1_p, w2_p, b2_p, g_p, be_p, mask)

    try:
        out = build_and_run(True)
    except Exception:
        # pipeline_mode=pl.Buffered(1) not accepted on this jax build; the
        # default double-buffered pipeline is functionally identical.
        out = build_and_run(False)

    return out[:M, :d_in].reshape(B, L, d_in)


def reference_ffn(x, w1, b1, w2, b2, gamma, beta):
    h = jnp.maximum(jnp.einsum("bld,dh->blh", x, w1) + b1, 0.0)
    y = jnp.einsum("blh,hd->bld", h, w2) + b2
    z = y + x
    mean = jnp.mean(z, axis=-1, keepdims=True)
    var = jnp.mean((z - mean) ** 2, axis=-1, keepdims=True)
    return (z - mean) / jnp.sqrt(var + EPS) * gamma + beta


if __name__ == "__main__":
    key = jax.random.PRNGKey(0)
    kx, k1, kb1, k2, kb2, k3, kb3, k4, kb4, kx2 = jax.random.split(key, 10)

    # ---- Case 1: canonical small shapes, auto tiling ----
    B, L, d_in, d_hid = 2, 8, 32, 64
    x = jax.random.normal(kx, (B, L, d_in), dtype=jnp.float32)
    # PyTorch w_1.weight is (d_hid, d_in, 1); we store the (d_in, d_hid) transpose
    # so the kernel computes x @ W1 directly (1x1 conv == per-position linear).
    w1 = jax.random.normal(k1, (d_in, d_hid), dtype=jnp.float32) * 0.1
    b1 = jax.random.normal(kb1, (d_hid,), dtype=jnp.float32) * 0.1
    w2 = jax.random.normal(k2, (d_hid, d_in), dtype=jnp.float32) * 0.1
    b2 = jax.random.normal(kb2, (d_in,), dtype=jnp.float32) * 0.1
    gamma = jnp.ones((d_in,), dtype=jnp.float32)   # nn.LayerNorm default init
    beta = jnp.zeros((d_in,), dtype=jnp.float32)

    out = jax.block_until_ready(positionwise_ffn(x, w1, b1, w2, b2, gamma, beta))
    ref = reference_ffn(x, w1, b1, w2, b2, gamma, beta)
    assert out.shape == (B, L, d_in)
    assert jnp.allclose(out, ref, atol=1e-5, rtol=1e-5), "mismatch vs reference (case 1)"

    # ---- Case 2: ragged shapes + forced small tiles -> multi-step grid on both
    # axes: M = 2*13 = 26 rows (tm=8 -> 4 row tiles) and d_hid = 300 (th=128 ->
    # >= 3 hidden slabs), exercising the f32 accumulator + epilogue gating. ----
    d_hid2 = 300
    x2 = jax.random.normal(kx2, (2, 13, d_in), dtype=jnp.float32)
    w1b = jax.random.normal(k3, (d_in, d_hid2), dtype=jnp.float32) * 0.1
    b1b = jax.random.normal(kb3, (d_hid2,), dtype=jnp.float32) * 0.1
    w2b = jax.random.normal(k4, (d_hid2, d_in), dtype=jnp.float32) * 0.1
    b2b = jax.random.normal(kb4, (d_in,), dtype=jnp.float32) * 0.1
    out2 = jax.block_until_ready(
        positionwise_ffn(x2, w1b, b1b, w2b, b2b, gamma, beta, tm=8, th=128))
    ref2 = reference_ffn(x2, w1b, b1b, w2b, b2b, gamma, beta)
    assert out2.shape == (2, 13, d_in)
    assert jnp.allclose(out2, ref2, atol=1e-4, rtol=1e-4), "mismatch vs reference (case 2)"

    # ---- Case 3: bf16 operands (fast MXU path); f32 accumulate + f32 LN keep the
    # epilogue numerics, so only bf16 rounding noise vs the f32 reference. ----
    out3 = jax.block_until_ready(
        positionwise_ffn(x.astype(jnp.bfloat16), w1.astype(jnp.bfloat16),
                         b1.astype(jnp.bfloat16), w2.astype(jnp.bfloat16),
                         b2.astype(jnp.bfloat16), gamma.astype(jnp.bfloat16),
                         beta.astype(jnp.bfloat16)))
    err = jnp.max(jnp.abs(out3.astype(jnp.float32) - ref))
    assert out3.dtype == jnp.bfloat16 and bool(jnp.isfinite(err)) and float(err) < 0.25, \
        "mismatch vs reference (case 3, bf16)"

    print("KERNEL_OK")
</pallas_src>

<mosaic_0001>
module attributes {stable_mosaic.version = 11 : i64} {
  func.func @ffn_kernel(%arg0: i32, %arg1: i32, %arg2: memref<8x128xf32, #tpu.memory_space<vmem>>, %arg3: memref<128x128xf32, #tpu.memory_space<vmem>>, %arg4: memref<1x128xf32, #tpu.memory_space<vmem>>, %arg5: memref<128x128xf32, #tpu.memory_space<vmem>>, %arg6: memref<1x128xf32, #tpu.memory_space<vmem>>, %arg7: memref<1x128xf32, #tpu.memory_space<vmem>>, %arg8: memref<1x128xf32, #tpu.memory_space<vmem>>, %arg9: memref<1x128xf32, #tpu.memory_space<vmem>>, %arg10: memref<8x128xf32, #tpu.memory_space<vmem>>, %arg11: memref<8x128xf32, #tpu.memory_space<vmem>>) attributes {dimension_semantics = [#tpu.dimension_semantics<parallel>, #tpu.dimension_semantics<arbitrary>], iteration_bounds = array<i64: 2, 1>, scalar_prefetch = 0 : i64, scratch_operands = 1 : i64, tpu.core_type = #tpu.core_type<tc>, window_params = [{transform_indices = @transform_0, window_bounds = array<i64: 8, 128>}, {pipeline_mode = #tpu.pipeline_mode<synchronous>, transform_indices = @transform_1, window_bounds = array<i64: 128, 128>}, {pipeline_mode = #tpu.pipeline_mode<synchronous>, transform_indices = @transform_2, window_bounds = array<i64: 1, 128>}, {pipeline_mode = #tpu.pipeline_mode<synchronous>, transform_indices = @transform_3, window_bounds = array<i64: 128, 128>}, {pipeline_mode = #tpu.pipeline_mode<synchronous>, transform_indices = @transform_4, window_bounds = array<i64: 1, 128>}, {pipeline_mode = #tpu.pipeline_mode<synchronous>, transform_indices = @transform_5, window_bounds = array<i64: 1, 128>}, {pipeline_mode = #tpu.pipeline_mode<synchronous>, transform_indices = @transform_6, window_bounds = array<i64: 1, 128>}, {pipeline_mode = #tpu.pipeline_mode<synchronous>, transform_indices = @transform_7, window_bounds = array<i64: 1, 128>}, {transform_indices = @transform_8, window_bounds = array<i64: 8, 128>}]} {
    %c0_i32 = arith.constant 0 : i32
    %0 = arith.cmpi eq, %arg1, %c0_i32 : i32
    %1 = arith.extui %0 : i1 to i32
    %c0_i32_0 = arith.constant 0 : i32
    %2 = arith.cmpi ne, %1, %c0_i32_0 : i32
    scf.if %2 {
      %cst_16 = arith.constant 0.000000e+00 : f32
      %19 = vector.broadcast %cst_16 : f32 to vector<8x128xf32>
      %c0_17 = arith.constant 0 : index
      %c0_18 = arith.constant 0 : index
      %20 = vector.load %arg11[%c0_17, %c0_18] : memref<8x128xf32, #tpu.memory_space<vmem>>, vector<8x128xf32>
      tpu.vector_store %arg11[%c0_17, %c0_18], %19 {strides = array<i32>} : memref<8x128xf32, #tpu.memory_space<vmem>>, vector<8x128xf32>,
    } else {
    }
    %c0 = arith.constant 0 : index
    %c0_1 = arith.constant 0 : index
    %3 = vector.load %arg2[%c0, %c0_1] : memref<8x128xf32, #tpu.memory_space<vmem>>, vector<8x128xf32>
    %c0_2 = arith.constant 0 : index
    %c0_3 = arith.constant 0 : index
    %4 = vector.load %arg3[%c0_2, %c0_3] : memref<128x128xf32, #tpu.memory_space<vmem>>, vector<128x128xf32>
    %cst = arith.constant dense<0.000000e+00> : vector<8x128xf32>
    %5 = tpu.matmul %3, %4, %cst {dimension_numbers = #tpu.dot_dimension_numbers<[1], [0], [0], [1], [0, 0, 1, 1], [], []>} : vector<8x128xf32>, vector<128x128xf32>, vector<8x128xf32> -> vector<8x128xf32>
    %c0_4 = arith.constant 0 : index
    %c0_5 = arith.constant 0 : index
    %6 = vector.load %arg4[%c0_4, %c0_5] : memref<1x128xf32, #tpu.memory_space<vmem>>, vector<1x128xf32>
    %7 = vector.broadcast %6 : vector<1x128xf32> to vector<8x128xf32>
    %8 = arith.addf %5, %7 : vector<8x128xf32>
    %cst_6 = arith.constant 0.000000e+00 : f32
    %9 = vector.broadcast %cst_6 : f32 to vector<8x128xf32>
    %10 = arith.maximumf %8, %9 : vector<8x128xf32>
    %c0_7 = arith.constant 0 : index
    %c0_8 = arith.constant 0 : index
    %11 = vector.load %arg11[%c0_7, %c0_8] : memref<8x128xf32, #tpu.memory_space<vmem>>, vector<8x128xf32>
    %c0_9 = arith.constant 0 : index
    %c0_10 = arith.constant 0 : index
    %12 = vector.load %arg5[%c0_9, %c0_10] : memref<128x128xf32, #tpu.memory_space<vmem>>, vector<128x128xf32>
    %cst_11 = arith.constant dense<0.000000e+00> : vector<8x128xf32>
    %13 = tpu.matmul %10, %12, %cst_11 {dimension_numbers = #tpu.dot_dimension_numbers<[1], [0], [0], [1], [0, 0, 1, 1], [], []>} : vector<8x128xf32>, vector<128x128xf32>, vector<8x128xf32> -> vector<8x128xf32>
    %14 = arith.addf %11, %13 : vector<8x128xf32>
    %c0_12 = arith.constant 0 : index
    %c0_13 = arith.constant 0 : index
    %15 = vector.load %arg11[%c0_12, %c0_13] : memref<8x128xf32, #tpu.memory_space<vmem>>, vector<8x128xf32>
    tpu.vector_store %arg11[%c0_12, %c0_13], %14 {strides = array<i32>} : memref<8x128xf32, #tpu.memory_space<vmem>>, vector<8x128xf32>,
    %c0_i32_14 = arith.constant 0 : i32
    %16 = arith.cmpi eq, %arg1, %c0_i32_14 : i32
    %17 = arith.extui %16 : i1 to i32
    %c0_i32_15 = arith.constant 0 : i32
    %18 = arith.cmpi ne, %17, %c0_i32_15 : i32
    scf.if %18 {
      %c0_16 = arith.constant 0 : index
      %c0_17 = arith.constant 0 : index
      %19 = vector.load %arg11[%c0_16, %c0_17] : memref<8x128xf32, #tpu.memory_space<vmem>>, vector<8x128xf32>
      %c0_18 = arith.constant 0 : index
      %c0_19 = arith.constant 0 : index
      %20 = vector.load %arg6[%c0_18, %c0_19] : memref<1x128xf32, #tpu.memory_space<vmem>>, vector<1x128xf32>
      %21 = vector.broadcast %20 : vector<1x128xf32> to vector<8x128xf32>
      %22 = arith.addf %19, %21 : vector<8x128xf32>
      %23 = arith.addf %22, %3 : vector<8x128xf32>
      %cst_20 = arith.constant dense<0.000000e+00> : vector<8xf32>
      %24 = vector.multi_reduction <add>, %23, %cst_20 [1] : vector<8x128xf32> to vector<8xf32>
      %25 = vector.shape_cast %24 : vector<8xf32> to vector<8x1xf32>
      %cst_21 = arith.constant 3.125000e-02 : f32
      %26 = vector.broadcast %cst_21 : f32 to vector<8x1xf32>
      %27 = arith.mulf %25, %26 : vector<8x1xf32>
      %28 = vector.broadcast %27 : vector<8x1xf32> to vector<8x128xf32>
      %29 = arith.subf %23, %28 : vector<8x128xf32>
      %c0_22 = arith.constant 0 : index
      %c0_23 = arith.constant 0 : index
      %30 = vector.load %arg9[%c0_22, %c0_23] : memref<1x128xf32, #tpu.memory_space<vmem>>, vector<1x128xf32>
      %31 = vector.broadcast %30 : vector<1x128xf32> to vector<8x128xf32>
      %32 = arith.mulf %29, %31 : vector<8x128xf32>
      %33 = arith.mulf %32, %32 : vector<8x128xf32>
      %cst_24 = arith.constant dense<0.000000e+00> : vector<8xf32>
      %34 = vector.multi_reduction <add>, %33, %cst_24 [1] : vector<8x128xf32> to vector<8xf32>
      %35 = vector.shape_cast %34 : vector<8xf32> to vector<8x1xf32>
      %cst_25 = arith.constant 3.125000e-02 : f32
      %36 = vector.broadcast %cst_25 : f32 to vector<8x1xf32>
      %37 = arith.mulf %35, %36 : vector<8x1xf32>
      %cst_26 = arith.constant 9.99999974E-6 : f32
      %38 = vector.broadcast %cst_26 : f32 to vector<8x1xf32>
      %39 = arith.addf %37, %38 : vector<8x1xf32>
      %40 = math.rsqrt %39 : vector<8x1xf32>
      %41 = vector.broadcast %40 : vector<8x1xf32> to vector<8x128xf32>
      %42 = arith.mulf %32, %41 : vector<8x128xf32>
      %c0_27 = arith.constant 0 : index
      %c0_28 = arith.constant 0 : index
      %43 = vector.load %arg7[%c0_27, %c0_28] : memref<1x128xf32, #tpu.memory_space<vmem>>, vector<1x128xf32>
      %44 = vector.broadcast %43 : vector<1x128xf32> to vector<8x128xf32>
      %45 = arith.mulf %42, %44 : vector<8x128xf32>
      %c0_29 = arith.constant 0 : index
      %c0_30 = arith.constant 0 : index
      %46 = vector.load %arg8[%c0_29, %c0_30] : memref<1x128xf32, #tpu.memory_space<vmem>>, vector<1x128xf32>
      %47 = vector.broadcast %46 : vector<1x128xf32> to vector<8x128xf32>
      %48 = arith.addf %45, %47 : vector<8x128xf32>
      %c0_31 = arith.constant 0 : index
      %c0_32 = arith.constant 0 : index
      %49 = vector.load %arg10[%c0_31, %c0_32] : memref<8x128xf32, #tpu.memory_space<vmem>>, vector<8x128xf32>
      tpu.vector_store %arg10[%c0_31, %c0_32], %48 {strides = array<i32>} : memref<8x128xf32, #tpu.memory_space<vmem>>, vector<8x128xf32>,
    } else {
    }
    return
  }
  func.func @transform_0(%arg0: i32, %arg1: i32) -> (i32, i32) {
    %c0_i32 = arith.constant 0 : i32
    %c0_i32_0 = arith.constant 0 : i32
    return %arg0, %c0_i32 : i32, i32
  }
  func.func @transform_1(%arg0: i32, %arg1: i32) -> (i32, i32) {
    %c0_i32 = arith.constant 0 : i32
    %c0_i32_0 = arith.constant 0 : i32
    return %c0_i32, %arg1 : i32, i32
  }
  func.func @transform_2(%arg0: i32, %arg1: i32) -> (i32, i32) {
    %c0_i32 = arith.constant 0 : i32
    %c0_i32_0 = arith.constant 0 : i32
    return %c0_i32, %arg1 : i32, i32
  }
  func.func @transform_3(%arg0: i32, %arg1: i32) -> (i32, i32) {
    %c0_i32 = arith.constant 0 : i32
    %c0_i32_0 = arith.constant 0 : i32
    return %arg1, %c0_i32 : i32, i32
  }
  func.func @transform_4(%arg0: i32, %arg1: i32) -> (i32, i32) {
    %c0_i32 = arith.constant 0 : i32
    %c0_i32_0 = arith.constant 0 : i32
    %c0_i32_1 = arith.constant 0 : i32
    return %c0_i32, %c0_i32_0 : i32, i32
  }
  func.func @transform_5(%arg0: i32, %arg1: i32) -> (i32, i32) {
    %c0_i32 = arith.constant 0 : i32
    %c0_i32_0 = arith.constant 0 : i32
    %c0_i32_1 = arith.constant 0 : i32
    return %c0_i32, %c0_i32_0 : i32, i32
  }
  func.func @transform_6(%arg0: i32, %arg1: i32) -> (i32, i32) {
    %c0_i32 = arith.constant 0 : i32
    %c0_i32_0 = arith.constant 0 : i32
    %c0_i32_1 = arith.constant 0 : i32
    return %c0_i32, %c0_i32_0 : i32, i32
  }
  func.func @transform_7(%arg0: i32, %arg1: i32) -> (i32, i32) {
    %c0_i32 = arith.constant 0 : i32
    %c0_i32_0 = arith.constant 0 : i32
    %c0_i32_1 = arith.constant 0 : i32
    return %c0_i32, %c0_i32_0 : i32, i32
  }
  func.func @transform_8(%arg0: i32, %arg1: i32) -> (i32, i32) {
    %c0_i32 = arith.constant 0 : i32
    %c0_i32_0 = arith.constant 0 : i32
    return %arg0, %c0_i32 : i32, i32
  }
}

module attributes {stable_mosaic.version = 11 : i64} {
  func.func @ffn_kernel(%arg0: i32, %arg1: i32, %arg2: memref<8x128xf32, #tpu.memory_space<vmem>>, %arg3: memref<128x128xf32, #tpu.memory_space<vmem>>, %arg4: memref<1x128xf32, #tpu.memory_space<vmem>>, %arg5: memref<128x128xf32, #tpu.memory_space<vmem>>, %arg6: memref<1x128xf32, #tpu.memory_space<vmem>>, %arg7: memref<1x128xf32, #tpu.memory_space<vmem>>, %arg8: memref<1x128xf32, #tpu.memory_space<vmem>>, %arg9: memref<1x128xf32, #tpu.memory_space<vmem>>, %arg10: memref<8x128xf32, #tpu.memory_space<vmem>>, %arg11: memref<8x128xf32, #tpu.memory_space<vmem>>) attributes {dimension_semantics = [#tpu.dimension_semantics<parallel>, #tpu.dimension_semantics<arbitrary>], iteration_bounds = array<i64: 2, 1>, scalar_prefetch = 0 : i64, scratch_operands = 1 : i64, tpu.core_type = #tpu.core_type<tc>, window_params = [{transform_indices = @transform_0, window_bounds = array<i64: 8, 128>}, {transform_indices = @transform_1, window_bounds = array<i64: 128, 128>}, {transform_indices = @transform_2, window_bounds = array<i64: 1, 128>}, {transform_indices = @transform_3, window_bounds = array<i64: 128, 128>}, {pipeline_mode = #tpu.pipeline_mode<synchronous>, transform_indices = @transform_4, window_bounds = array<i64: 1, 128>}, {pipeline_mode = #tpu.pipeline_mode<synchronous>, transform_indices = @transform_5, window_bounds = array<i64: 1, 128>}, {pipeline_mode = #tpu.pipeline_mode<synchronous>, transform_indices = @transform_6, window_bounds = array<i64: 1, 128>}, {pipeline_mode = #tpu.pipeline_mode<synchronous>, transform_indices = @transform_7, window_bounds = array<i64: 1, 128>}, {transform_indices = @transform_8, window_bounds = array<i64: 8, 128>}]} {
    %c0_i32 = arith.constant 0 : i32
    %0 = arith.cmpi eq, %arg1, %c0_i32 : i32
    %1 = arith.extui %0 : i1 to i32
    %c0_i32_0 = arith.constant 0 : i32
    %2 = arith.cmpi ne, %1, %c0_i32_0 : i32
    scf.if %2 {
      %cst_16 = arith.constant 0.000000e+00 : f32
      %19 = vector.broadcast %cst_16 : f32 to vector<8x128xf32>
      %c0_17 = arith.constant 0 : index
      %c0_18 = arith.constant 0 : index
      %20 = vector.load %arg11[%c0_17, %c0_18] : memref<8x128xf32, #tpu.memory_space<vmem>>, vector<8x128xf32>
      tpu.vector_store %arg11[%c0_17, %c0_18], %19 {strides = array<i32>} : memref<8x128xf32, #tpu.memory_space<vmem>>, vector<8x128xf32>,
    } else {
    }
    %c0 = arith.constant 0 : index
    %c0_1 = arith.constant 0 : index
    %3 = vector.load %arg2[%c0, %c0_1] : memref<8x128xf32, #tpu.memory_space<vmem>>, vector<8x128xf32>
    %c0_2 = arith.constant 0 : index
    %c0_3 = arith.constant 0 : index
    %4 = vector.load %arg3[%c0_2, %c0_3] : memref<128x128xf32, #tpu.memory_space<vmem>>, vector<128x128xf32>
    %cst = arith.constant dense<0.000000e+00> : vector<8x128xf32>
    %5 = tpu.matmul %3, %4, %cst {dimension_numbers = #tpu.dot_dimension_numbers<[1], [0], [0], [1], [0, 0, 1, 1], [], []>} : vector<8x128xf32>, vector<128x128xf32>, vector<8x128xf32> -> vector<8x128xf32>
    %c0_4 = arith.constant 0 : index
    %c0_5 = arith.constant 0 : index
    %6 = vector.load %arg4[%c0_4, %c0_5] : memref<1x128xf32, #tpu.memory_space<vmem>>, vector<1x128xf32>
    %7 = vector.broadcast %6 : vector<1x128xf32> to vector<8x128xf32>
    %8 = arith.addf %5, %7 : vector<8x128xf32>
    %cst_6 = arith.constant 0.000000e+00 : f32
    %9 = vector.broadcast %cst_6 : f32 to vector<8x128xf32>
    %10 = arith.maximumf %8, %9 : vector<8x128xf32>
    %c0_7 = arith.constant 0 : index
    %c0_8 = arith.constant 0 : index
    %11 = vector.load %arg11[%c0_7, %c0_8] : memref<8x128xf32, #tpu.memory_space<vmem>>, vector<8x128xf32>
    %c0_9 = arith.constant 0 : index
    %c0_10 = arith.constant 0 : index
    %12 = vector.load %arg5[%c0_9, %c0_10] : memref<128x128xf32, #tpu.memory_space<vmem>>, vector<128x128xf32>
    %cst_11 = arith.constant dense<0.000000e+00> : vector<8x128xf32>
    %13 = tpu.matmul %10, %12, %cst_11 {dimension_numbers = #tpu.dot_dimension_numbers<[1], [0], [0], [1], [0, 0, 1, 1], [], []>} : vector<8x128xf32>, vector<128x128xf32>, vector<8x128xf32> -> vector<8x128xf32>
    %14 = arith.addf %11, %13 : vector<8x128xf32>
    %c0_12 = arith.constant 0 : index
    %c0_13 = arith.constant 0 : index
    %15 = vector.load %arg11[%c0_12, %c0_13] : memref<8x128xf32, #tpu.memory_space<vmem>>, vector<8x128xf32>
    tpu.vector_store %arg11[%c0_12, %c0_13], %14 {strides = array<i32>} : memref<8x128xf32, #tpu.memory_space<vmem>>, vector<8x128xf32>,
    %c0_i32_14 = arith.constant 0 : i32
    %16 = arith.cmpi eq, %arg1, %c0_i32_14 : i32
    %17 = arith.extui %16 : i1 to i32
    %c0_i32_15 = arith.constant 0 : i32
    %18 = arith.cmpi ne, %17, %c0_i32_15 : i32
    scf.if %18 {
      %c0_16 = arith.constant 0 : index
      %c0_17 = arith.constant 0 : index
      %19 = vector.load %arg11[%c0_16, %c0_17] : memref<8x128xf32, #tpu.memory_space<vmem>>, vector<8x128xf32>
      %c0_18 = arith.constant 0 : index
      %c0_19 = arith.constant 0 : index
      %20 = vector.load %arg6[%c0_18, %c0_19] : memref<1x128xf32, #tpu.memory_space<vmem>>, vector<1x128xf32>
      %21 = vector.broadcast %20 : vector<1x128xf32> to vector<8x128xf32>
      %22 = arith.addf %19, %21 : vector<8x128xf32>
      %23 = arith.addf %22, %3 : vector<8x128xf32>
      %cst_20 = arith.constant dense<0.000000e+00> : vector<8xf32>
      %24 = vector.multi_reduction <add>, %23, %cst_20 [1] : vector<8x128xf32> to vector<8xf32>
      %25 = vector.shape_cast %24 : vector<8xf32> to vector<8x1xf32>
      %cst_21 = arith.constant 3.125000e-02 : f32
      %26 = vector.broadcast %cst_21 : f32 to vector<8x1xf32>
      %27 = arith.mulf %25, %26 : vector<8x1xf32>
      %28 = vector.broadcast %27 : vector<8x1xf32> to vector<8x128xf32>
      %29 = arith.subf %23, %28 : vector<8x128xf32>
      %c0_22 = arith.constant 0 : index
      %c0_23 = arith.constant 0 : index
      %30 = vector.load %arg9[%c0_22, %c0_23] : memref<1x128xf32, #tpu.memory_space<vmem>>, vector<1x128xf32>
      %31 = vector.broadcast %30 : vector<1x128xf32> to vector<8x128xf32>
      %32 = arith.mulf %29, %31 : vector<8x128xf32>
      %33 = arith.mulf %32, %32 : vector<8x128xf32>
      %cst_24 = arith.constant dense<0.000000e+00> : vector<8xf32>
      %34 = vector.multi_reduction <add>, %33, %cst_24 [1] : vector<8x128xf32> to vector<8xf32>
      %35 = vector.shape_cast %34 : vector<8xf32> to vector<8x1xf32>
      %cst_25 = arith.constant 3.125000e-02 : f32
      %36 = vector.broadcast %cst_25 : f32 to vector<8x1xf32>
      %37 = arith.mulf %35, %36 : vector<8x1xf32>
      %cst_26 = arith.constant 9.99999974E-6 : f32
      %38 = vector.broadcast %cst_26 : f32 to vector<8x1xf32>
      %39 = arith.addf %37, %38 : vector<8x1xf32>
      %40 = math.rsqrt %39 : vector<8x1xf32>
      %41 = vector.broadcast %40 : vector<8x1xf32> to vector<8x128xf32>
      %42 = arith.mulf %32, %41 : vector<8x128xf32>
      %c0_27 = arith.constant 0 : index
      %c0_28 = arith.constant 0 : index
      %43 = vector.load %arg7[%c0_27, %c0_28] : memref<1x128xf32, #tpu.memory_space<vmem>>, vector<1x128xf32>
      %44 = vector.broadcast %43 : vector<1x128xf32> to vector<8x128xf32>
      %45 = arith.mulf %42, %44 : vector<8x128xf32>
      %c0_29 = arith.constant 0 : index
      %c0_30 = arith.constant 0 : index
      %46 = vector.load %arg8[%c0_29, %c0_30] : memref<1x128xf32, #tpu.memory_space<vmem>>, vector<1x128xf32>
      %47 = vector.broadcast %46 : vector<1x128xf32> to vector<8x128xf32>
      %48 = arith.addf %45, %47 : vector<8x128xf32>
      %c0_31 = arith.constant 0 : index
      %c0_32 = arith.constant 0 : index
      %49 = vector.load %arg10[%c0_31, %c0_32] : memref<8x128xf32, #tpu.memory_space<vmem>>, vector<8x128xf32>
      tpu.vector_store %arg10[%c0_31, %c0_32], %48 {strides = array<i32>} : memref<8x128xf32, #tpu.memory_space<vmem>>, vector<8x128xf32>,
    } else {
    }
    return
  }
  func.func @transform_0(%arg0: i32, %arg1: i32) -> (i32, i32) {
    %c0_i32 = arith.constant 0 : i32
    %c0_i32_0 = arith.constant 0 : i32
    return %arg0, %c0_i32 : i32, i32
  }
  func.func @transform_1(%arg0: i32, %arg1: i32) -> (i32, i32) {
    %c0_i32 = arith.constant 0 : i32
    %c0_i32_0 = arith.constant 0 : i32
    return %c0_i32, %arg1 : i32, i32
  }
  func.func @transform_2(%arg0: i32, %arg1: i32) -> (i32, i32) {
    %c0_i32 = arith.constant 0 : i32
    %c0_i32_0 = arith.constant 0 : i32
    return %c0_i32, %arg1 : i32, i32
  }
  func.func @transform_3(%arg0: i32, %arg1: i32) -> (i32, i32) {
    %c0_i32 = arith.constant 0 : i32
    %c0_i32_0 = arith.constant 0 : i32
    return %arg1, %c0_i32 : i32, i32
  }
  func.func @transform_4(%arg0: i32, %arg1: i32) -> (i32, i32) {
    %c0_i32 = arith.constant 0 : i32
    %c0_i32_0 = arith.constant 0 : i32
    %c0_i32_1 = arith.constant 0 : i32
    return %c0_i32, %c0_i32_0 : i32, i32
  }
  func.func @transform_5(%arg0: i32, %arg1: i32) -> (i32, i32) {
    %c0_i32 = arith.constant 0 : i32
    %c0_i32_0 = arith.constant 0 : i32
    %c0_i32_1 = arith.constant 0 : i32
    return %c0_i32, %c0_i32_0 : i32, i32
  }
  func.func @transform_6(%arg0: i32, %arg1: i32) -> (i32, i32) {
    %c0_i32 = arith.constant 0 : i32
    %c0_i32_0 = arith.constant 0 : i32
    %c0_i32_1 = arith.constant 0 : i32
    return %c0_i32, %c0_i32_0 : i32, i32
  }
  func.func @transform_7(%arg0: i32, %arg1: i32) -> (i32, i32) {
    %c0_i32 = arith.constant 0 : i32
    %c0_i32_0 = arith.constant 0 : i32
    %c0_i32_1 = arith.constant 0 : i32
    return %c0_i32, %c0_i32_0 : i32, i32
  }
  func.func @transform_8(%arg0: i32, %arg1: i32) -> (i32, i32) {
    %c0_i32 = arith.constant 0 : i32
    %c0_i32_0 = arith.constant 0 : i32
    return %arg0, %c0_i32 : i32, i32
  }
}

</mosaic_0001>

<bundles_post_ra>
// kernel: tpu_custom_call.1
= control target key start
LH: loop header
LB: loop body
LE: loop exit
PB: predicated region body
PF: predicated region fallthrough
CT: control target
= control target key end

     0   :  { %s1538_s0 = inlined_call_operand.hbm [shape: f32[16,128], index: 0, kind: input, shape index: {}]   ;;  %s1539_s1 = inlined_call_operand.hbm [shape: f32[128,128], index: 1, kind: input, shape index: {}]   ;;  %s1540_s2 = inlined_call_operand.vmem [shape: f32[1,128], index: 2, kind: input, shape index: {}]   ;;  %s1541_s3 = inlined_call_operand.hbm [shape: f32[128,128], index: 3, kind: input, shape index: {}]   ;;  %s1542_s4 = inlined_call_operand.vmem [shape: f32[1,128], index: 4, kind: input, shape index: {}]   ;;  %s1543_s5 = inlined_call_operand.vmem [shape: f32[1,128], index: 5, kind: input, shape index: {}]   ;;  %s1544_s6 = inlined_call_operand.vmem [shape: f32[1,128], index: 6, kind: input, shape index: {}]   ;;  %s1545_s7 = inlined_call_operand.vmem [shape: f32[1,128], index: 7, kind: input, shape index: {}]   ;;  %s1546_s8 = inlined_call_operand.hbm [shape: f32[16,128], index: 8, kind: output, shape index: {}]  }
   0x1   :  { %1554 = sst [smem:[#allocation15_spill]] %s1546_s8 }
   0x2   :  { %13 = vsyncpa [#allocation4], 0 }
   0x3   :  { %15 = vsyncpa [#allocation4 + $0x1], 0 }
   0x4   :  { %16 = vsyncpa [#allocation7], 0 }
   0x5   :  { %17 = vsyncpa [#allocation5], 0 }
   0x6   :  { %19 = vsyncpa [#allocation5 + $0x1], 0  ;;  %s1250_s27 = smov 0   ;;  %s1252_s28 = smov 0  }
   0x7   :  { %s1254_s29 = smov 0   ;;  %s1256_s30 = smov 0  }
   0x8   :  { %s1258_s9 = smov 0   ;;  %s1260_s10 = smov 0  }
   0x9 LB: > { %1555 = sst [smem:[#allocation13_spill]] %s1174_s27  ;;  %s757_s11 = sadd.s32 4294967295, %s1194_s10   ;;  %s1194_s10 = sphi %s1260_s10, %s25_s10   ;;  %s1190_s9 = sphi %s1258_s9, %s1577_s9   ;;  %s1186_s30 = sphi %s1256_s30, %s1576_s30   ;;  %s1182_s29 = sphi %s1254_s29, %s1575_s29   ;;  %s1178_s28 = sphi %s1252_s28, %s1574_s28   ;;  %s1174_s27 = sphi %s1250_s27, %s1573_s27  }
   0xa   : > { %s758_s12 = sadd.s32 4294967294, %s1194_s10   ;;  %p57_p0 = scmp.ne.s32.totalorder %s1178_s28, %s1174_s27 }
   0xb   : > { %p1284_p1 = scmp.eq.s32.totalorder %s757_s11, 0  ;;  %p1288_p2 = scmp.eq.s32.totalorder %s757_s11, 1 }
   0xc   : > { %p249_p3 = scmp.eq.s32.totalorder %s758_s12, 1  ;;  %p759_p5 = scmp.ge.s32.totalorder %s1194_s10, 1 }
   0xd   : > { %s1556_s13 = scalar_select %p1284_p1, 1, 0 }
   0xe   : > { %p1294_p4 = por %p1284_p1, %p57_p0  ;;  %p1299_p6 = por %p249_p3, %p57_p0 }
   0xf   : > { %p256_p7 = scmp.lt.s32.totalorder %s1194_s10, 3  ;;  %s1196_s18 = smov [#allocation6]  }
  0x10   : > { %s1558_s15 = scalar_select %p1294_p4, 1, 0 }
  0x11   : > { %s1559_s16 = scalar_select %p1299_p6, 1, 0 }
  0x12   : > { %p1304_p8 = pnand %p759_p5, %p256_p7  ;;  %s270_s19 = sshll.u32 %s1196_s18, 4  ;;  %s1308_s19 = int_to_ptr.vmem [resolvable:$true] %s270_s19 }
  0x13   : > { %1560 = sst [smem:[#allocation14_spill]] %s1559_s16  ;;  %s1197_s21 = smov [#allocation8]  }
  0x14   : > { %p944_p9 = pneg %p1304_p8  ;;  %s292_s22 = sshll.u32 %s1197_s21, 4  ;;  %s1319_s22 = int_to_ptr.vmem [resolvable:$true] %s292_s22 }
  0x15   : > { %s1022_s25 = scalar_lea.hbm %s1539_s1, 2048 }
  0x16   : > { %p1315_p11 = pnand %p944_p9, %p1284_p1  ;;  %p1023_p12 = scmp.ne.s32.totalorder %s1539_s1, %s1022_s25 }
  0x17   : > { %p1029_p5 = scmp.lt.u32.totalorder %s1022_s25, %s1539_s1 }
  0x18   : > { %p1024_p13 = pneg %p1315_p11 }
  0x1a   : > { %p1025_p0 = pnand %p1024_p13, %p1023_p12 }
  0x1c   : > { %p1026_p3 = pneg %p1025_p0 }
  0x1e   : > { %p1031_p7 = pnand %p1029_p5, %p1026_p3 }
  0x20   : > { %1034 = shalt.err (!%p1031_p7)
}
  0x21   : > { %s1035_s21 = scalar_lea.vmem %s1308_s19, 2048  ;;  %p1043_p1 = scmp.lt.s32.totalorder %s1308_s19, %s1308_s19 }
  0x22   : > { %p1036_p9 = scmp.ne.s32.totalorder %s1308_s19, %s1035_s21  ;;  %p1044_p12 = scmp.lt.s32.totalorder %s1035_s21, %s1035_s21 }
  0x24   : > { %p1038_p10 = pnand %p1036_p9, %p1024_p13  ;;  %p1045_p0 = por %p1044_p12, %p1043_p1 }
  0x26   : > { %p1039_p6 = pneg %p1038_p10 }
  0x28   : > { %p1046_p4 = pnand %p1045_p0, %p1039_p6 }
  0x2a   : > { %1049 = shalt.err (!%p1046_p4)
}
  0x2b   : > { %s1198_s23 = smov 128   ;;  %s1199_s24 = smov 8  }
  0x2c   : > { %947 = dma.hbm_to_vmem [thread:$0]  (!%p1315_p11), %s1539_s1, 2048, %s1308_s19, [#allocation7], %s1198_s23, %s1198_s23, %s1199_s24  }
  0x2d   : > { %s1050_s18 = scalar_lea.hbm %s1541_s3, 2048 }
  0x2e   : > { %p1051_p1 = scmp.ne.s32.totalorder %s1541_s3, %s1050_s18  ;;  %p1057_p10 = scmp.lt.u32.totalorder %s1050_s18, %s1541_s3 }
  0x30   : > { %p1053_p4 = pnand %p1051_p1, %p1024_p13 }
  0x32   : > { %p1054_p6 = pneg %p1053_p4 }
  0x34   : > { %p1059_p3 = pnand %p1057_p10, %p1054_p6 }
  0x36   : > { %1062 = shalt.err (!%p1059_p3)
}
  0x37   : > { %s1063_s19 = scalar_lea.vmem %s1319_s22, 2048  ;;  %p1071_p12 = scmp.lt.s32.totalorder %s1319_s22, %s1319_s22 }
  0x38   : > { %p1064_p5 = scmp.ne.s32.totalorder %s1319_s22, %s1063_s19  ;;  %p1072_p0 = scmp.lt.s32.totalorder %s1063_s19, %s1063_s19 }
  0x3a   : > { %p1066_p7 = pnand %p1064_p5, %p1024_p13  ;;  %p1073_p1 = por %p1072_p0, %p1071_p12 }
  0x3c   : > { %p1067_p9 = pneg %p1066_p7 }
  0x3e   : > { %p1074_p4 = pnand %p1073_p1, %p1067_p9 }
  0x40   : > { %1077 = shalt.err (!%p1074_p4)
}
  0x41   : > { %950 = dma.hbm_to_vmem [thread:$0]  (!%p1315_p11), %s1541_s3, 2048, %s1319_s22, [#allocation7], %s1198_s23, %s1198_s23, %s1199_s24  }
  0x42   : > { %s37_s16 = sadd.s32 1, %s1190_s9  ;;  %s44_s25 = sadd.s32 1, %s1182_s29 }
  0x43   : > { %p39_p13 = scmp.ge.s32.totalorder %s37_s16, 2  ;;  %p51_p6 = scmp.ne.s32.totalorder %s1182_s29, %s1178_s28 }
  0x44   : > { %p52_p10 = scmp.eq.s32.totalorder %s1194_s10, 0  ;;  %p961_p3 = scmp.lt.s32.totalorder %s1194_s10, 2 }
  0x45   : > { %s1579_s16 = smov (%p39_p13, %s37_s16), 0  ;;  %p1383_p7 = por %p1288_p2, %p51_p6 }
  0x46   : > { %p53_p5 = por %p52_p10, %p51_p6  ;;  %s41_s26 = ssub.s32 %s1190_s9, %s1579_s16 }
  0x47   : > { %s1563_s20 = scalar_select %p1383_p7, 1, 0 }
  0x48   : > { %s318_s11 = sand.u32 1, %s1182_s29   ;;  %p42_p9 = scmp.eq.s32.totalorder %s41_s26, 0 }
  0x49   : > { %s764_s22 = sshll.u32 %s318_s11, 3  ;;  %s765_s23 = sshll.u32 %s1190_s9, 7 }
  0x4a   : > { %s1392_s24 = scalar_select %p42_p9, %s1182_s29, %s44_s25  }
  0x4b   : > { %s1397_s21 = scalar_lea.hbm %s1538_s0, %s765_s23  ;;  %s322_s14 = scalar_lea.vmem [#allocation3], %s764_s22 }
  0x4c   : > { %s329_s19 = sshll.u32 %s322_s14, 4  ;;  %p1401_p2 = pnand %p961_p3, %p53_p5  ;;  %s1405_s19 = int_to_ptr.vmem [resolvable:$true] %s329_s19 }
  0x4d   : > { %s319_s27 = scalar_lea.sflag [#allocation4], %s318_s11  ;;  %s1078_s25 = scalar_lea.hbm %s1397_s21, 128 }
  0x4e   : > { %p1079_p11 = scmp.ne.s32.totalorder %s1397_s21, %s1078_s25  ;;  %p1080_p12 = pneg %p1401_p2 }
  0x4f   : > { %s1083_s23 = scalar_lea.hbm %s1538_s0, 256  ;;  %p1084_p4 = scmp.lt.u32.totalorder %s1397_s21, %s1538_s0 }
  0x50   : > { %p1081_p0 = pnand %p1080_p12, %p1079_p11  ;;  %p1085_p13 = scmp.lt.u32.totalorder %s1083_s23, %s1078_s25 }
  0x51   : > { %p1087_p10 = scmp.lt.u32.totalorder %s1078_s25, %s1397_s21 }
  0x52   : > { %p1082_p1 = pneg %p1081_p0  ;;  %p1086_p6 = por %p1085_p13, %p1084_p4 }
  0x54   : > { %p1088_p3 = por %p1087_p10, %p1086_p6 }
  0x56   : > { %p1089_p5 = pnand %p1088_p3, %p1082_p1 }
  0x58   : > { %1092 = shalt.err (!%p1089_p5)
}
  0x59   : > { %s1093_s11 = scalar_lea.vmem %s1405_s19, 128  ;;  %s1200_s14 = smov [#allocation3]  }
  0x5a   : > { %p1094_p9 = scmp.ne.s32.totalorder %s1405_s19, %s1093_s11  ;;  %s1098_s26 = sshll.u32 %s1200_s14, 4  ;;  %s1099_s26 = int_to_ptr.vmem [resolvable:$false] %s1098_s26 }
  0x5b   : > { %s1100_s22 = scalar_lea.vmem %s1099_s26, 256  ;;  %p1101_p7 = scmp.lt.s32.totalorder %s1405_s19, %s1099_s26 }
  0x5c   : > { %p1096_p11 = pnand %p1094_p9, %p1080_p12  ;;  %p1102_p4 = scmp.lt.s32.totalorder %s1100_s22, %s1093_s11 }
  0x5e   : > { %p1097_p0 = pneg %p1096_p11  ;;  %p1103_p13 = por %p1102_p4, %p1101_p7 }
  0x60   : > { %p1104_p6 = pnand %p1103_p13, %p1097_p0 }
  0x62   : > { %1107 = shalt.err (!%p1104_p6)
}
  0x63   : > { %954 = dma.hbm_to_vmem [thread:$0]  (!%p1401_p2), %s1397_s21, 128, %s1405_s19, %s319_s27  }
  0x64   : > { %338 = sbr.rel (%p1304_p8) target bundleno = 905 (0x389), region = 52  ;;  %s1435_s25 = sand.u32 (!%p1304_p8), 1, %s1178_s28  }
  0x65   : > { %s767_s23 = sshll.u32 (!%p1304_p8), %s1435_s25, 3  ;;  %s341_s12 = scalar_lea.sflag (!%p1304_p8), [#allocation4], %s1435_s25 }
  0x66   : > { %s1441_s18 = scalar_lea.vmem (!%p1304_p8), [#allocation3], %s767_s23  ;;  %p1565_p7 = scmp.ne.s32.totalorder (!%p1304_p8), %s1558_s15, 0 }
  0x6b   : > { %1161 = dma.done.wait (%p1565_p7), %s341_s12, 128  }
  0x6c   : > { %1163 = vsyncadd (%p1565_p7), %s341_s12, 4294967168  ;;  %p1566_p2 = scmp.ne.s32.totalorder %s1556_s13, 0 }
  0x6e   : > { %1165 = dma.done.wait (%p1566_p2), [#allocation7], 4096  }
  0x6f   : > { %1167 = vsyncadd (%p1566_p2), [#allocation7], 4294963200  ;;  %v1201_v0 = vmov 0.0|0.0   ;;  %vm1202_vm0 = vmmov 0   ;;  %v1203_v1 = vmov 0.0   ;;  %v398_v2 = vld [vmem:[#allocation6] sm:$0xff] }
  0x70   : > { %884 = vmatprep.subr.bf16.mxu0 %v1201_v0  ;;  %846 = vmatprep.mubr.msk.f32.mxu0 %vm1202_vm0, %v1203_v1  ;;  %v399_v3 = vld [vmem:[#allocation6 + $0x8] sm:$0xff]  ;;  %v400_v4 = vld [vmem:[#allocation6 + $0x10] sm:$0xff]  ;;  %v401_v6 = vld [vmem:[#allocation6 + $0x18] sm:$0xff]  ;;  %s777_s22 = sshll.u32 %s1186_s30, 7  ;;  %s387_s12 = scalar_lea.vmem [#allocation9], %s767_s23 }
  0x71   : > { %908 = vmatprep.subr.bf16.mxu1 %v1201_v0  ;;  %881 = vmatprep.mubr.msk.f32.mxu1 %vm1202_vm0, %v1203_v1  ;;  %v885_v5 = vpack.c.bf16 %v399_v3, %v398_v2  ;;  %v888_v7 = vpack.c.bf16 %v401_v6, %v400_v4  ;;  %v402_v8 = vld [vmem:[#allocation6 + $0x20] sm:$0xff]  ;;  %v403_v9 = vld [vmem:[#allocation6 + $0x28] sm:$0xff]  ;;  %v495_v12 = vld [vmem:[#allocation8 + $0x10] sm:$0xff]  ;;  %s1567_s17 = sld [smem:[#allocation15_spill]]  ;;  %s631_s19 = scalar_lea.sflag [#allocation5], %s1435_s25 }
  0x72   : > { %v493_v10 = vld [vmem:[#allocation8] sm:$0xff]  ;;  %v494_v11 = vld [vmem:[#allocation8 + $0x8] sm:$0xff]  ;;  %v496_v13 = vld [vmem:[#allocation8 + $0x18] sm:$0xff]  ;;  %v891_v14 = vpack.c.bf16 %v403_v9, %v402_v8  ;;  %p1568_p12 = scmp.ne.s32.totalorder %s1563_s20, 0  ;;  %s1204_s30 = smov [#allocation9]  }
  0x73   : > { %886 = vmatpush3.bf16.msra.mxu0 %v885_v5  ;;  %v909_v15 = vpack.c.bf16 %v494_v11, %v493_v10  ;;  %v404_v16 = vld [vmem:[#allocation6 + $0x30] sm:$0xff]  ;;  %v405_v17 = vld [vmem:[#allocation6 + $0x38] sm:$0xff]  ;;  %v912_v18 = vpack.c.bf16 %v496_v13, %v495_v12  ;;  %v497_v19 = vld [vmem:[#allocation8 + $0x20] sm:$0xff]  ;;  %s1112_s23 = sshll.u32 %s1204_s30, 4  ;;  %s1113_s23 = int_to_ptr.vmem [resolvable:$false] %s1112_s23 }
  0x74   : > { %887 = vmatprep.subr.bf16.mxu0 %v1201_v0  ;;  %v498_v20 = vld [vmem:[#allocation8 + $0x28] sm:$0xff]  ;;  %v894_v21 = vpack.c.bf16 %v405_v17, %v404_v16  ;;  %v406_v22 = vld [vmem:[#allocation6 + $0x40] sm:$0xff]  ;;  %v499_v25 = vld [vmem:[#allocation8 + $0x30] sm:$0xff]  ;;  %s1114_s27 = scalar_lea.vmem %s1113_s23, 256 }
  0x75   : > { %910 = vmatpush3.bf16.msra.mxu1 %v909_v15  ;;  %v407_v23 = vld [vmem:[#allocation6 + $0x48] sm:$0xff]  ;;  %v915_v24 = vpack.c.bf16 %v498_v20, %v497_v19  ;;  %v500_v26 = vld [vmem:[#allocation8 + $0x38] sm:$0xff]  ;;  %v408_v28 = vld [vmem:[#allocation6 + $0x50] sm:$0xff] }
  0x76   : > { %911 = vmatprep.subr.bf16.mxu1 %v1201_v0  ;;  %v897_v27 = vpack.c.bf16 %v407_v23, %v406_v22  ;;  %v409_v29 = vld [vmem:[#allocation6 + $0x58] sm:$0xff]  ;;  %v918_v30 = vpack.c.bf16 %v500_v26, %v499_v25  ;;  %v501_v31 = vld [vmem:[#allocation8 + $0x40] sm:$0xff]  ;;  %v502_v32 = vld [vmem:[#allocation8 + $0x48] sm:$0xff] }
  0x77   : > { %889 = vmatpush3.bf16.msra.mxu0 %v888_v7  ;;  %v900_v33 = vpack.c.bf16 %v409_v29, %v408_v28  ;;  %v410_v34 = vld [vmem:[#allocation6 + $0x60] sm:$0xff]  ;;  %v411_v35 = vld [vmem:[#allocation6 + $0x68] sm:$0xff]  ;;  %v921_v36 = vpack.c.bf16 %v502_v32, %v501_v31  ;;  %v503_v37 = vld [vmem:[#allocation8 + $0x50] sm:$0xff]  ;;  %s1489_s21 = scalar_lea.hbm %s1567_s17, %s777_s22 }
  0x78   : > { %890 = vmatprep.subr.bf16.mxu0 %v1201_v0  ;;  %v504_v38 = vld [vmem:[#allocation8 + $0x58] sm:$0xff]  ;;  %v903_v39 = vpack.c.bf16 %v411_v35, %v410_v34  ;;  %v412_v40 = vld [vmem:[#allocation6 + $0x70] sm:$0xff]  ;;  %v505_v43 = vld [vmem:[#allocation8 + $0x60] sm:$0xff] }
  0x79   : > { %913 = vmatpush3.bf16.msra.mxu1 %v912_v18  ;;  %v413_v41 = vld [vmem:[#allocation6 + $0x78] sm:$0xff]  ;;  %v924_v42 = vpack.c.bf16 %v504_v38, %v503_v37  ;;  %v506_v44 = vld [vmem:[#allocation8 + $0x68] sm:$0xff]  ;;  %v507_v48 = vld [vmem:[#allocation8 + $0x70] sm:$0xff] }
  0x7a   : > { %914 = vmatprep.subr.bf16.mxu1 %v1201_v0  ;;  %v906_v45 = vpack.c.bf16 %v413_v41, %v412_v40  ;;  %v927_v46 = vpack.c.bf16 %v506_v44, %v505_v43  ;;  %v397_v47 = vld [vmem:[%s1441_s18] sm:$0xff]  ;;  %s644_s18 = sshll.u32 %s387_s12, 4  ;;  %s1491_s18 = int_to_ptr.vmem [resolvable:$true] %s644_s18 }
  0x7b   : > { %892 = vmatpush3.bf16.msra.mxu0 %v891_v14  ;;  %v508_v49 = vld [vmem:[#allocation8 + $0x78] sm:$0xff]  ;;  %v771_v51 = vld [vmem:[%s1540_s2] ss:$0 sm:$0xff]  ;;  %s1108_s8 = scalar_lea.vmem %s1491_s18, 128  ;;  %p1115_p3 = scmp.lt.s32.totalorder %s1491_s18, %s1113_s23 }
  0x7c   : > { %893 = vmatprep.subr.bf16.mxu0 %v1201_v0  ;;  %v930_v50 = vpack.c.bf16 %v508_v49, %v507_v48  ;;  %v772_v56 = vld [vmem:[%s1542_s4] ss:$0 sm:$0xff]  ;;  %p1109_p8 = scmp.ne.s32.totalorder %s1491_s18, %s1108_s8  ;;  %p1116_p5 = scmp.lt.s32.totalorder %s1114_s27, %s1108_s8 }
  0x7d   : > { %916 = vmatpush3.bf16.msra.mxu1 %v915_v24  ;;  %v773_v63 = vld [vmem:[%s1545_s7] ss:$0 sm:$0xff] }
  0x7e   : > { %917 = vmatprep.subr.bf16.mxu1 %v1201_v0  ;;  %v774_v7 = vld [vmem:[%s1543_s5] ss:$0 sm:$0xff]  ;;  %p1110_p1 = pnand %p1109_p8, %p1568_p12  ;;  %p1117_p9 = por %p1116_p5, %p1115_p3 }
  0x7f   : > { %895 = vmatpush3.bf16.msra.mxu0 %v894_v21  ;;  %v775_v9 = vld [vmem:[%s1544_s6] ss:$0 sm:$0xff] }
  0x80   : > { %896 = vmatprep.subr.bf16.mxu0 %v1201_v0  ;;  %p1111_p10 = pneg %p1110_p1 }
  0x81   : > { %919 = vmatpush3.bf16.msra.mxu1 %v918_v30 }
  0x82   : > { %920 = vmatprep.subr.bf16.mxu1 %v1201_v0  ;;  %p1118_p11 = pnand %p1117_p9, %p1111_p10 }
  0x83   : > { %898 = vmatpush3.bf16.msra.mxu0 %v897_v27 }
  0x84   : > { %899 = vmatprep.subr.bf16.mxu0 %v1201_v0 }
  0x85   : > { %922 = vmatpush3.bf16.msra.mxu1 %v921_v36 }
  0x86   : > { %923 = vmatprep.subr.bf16.mxu1 %v1201_v0 }
  0x87   : > { %901 = vmatpush3.bf16.msra.mxu0 %v900_v33 }
  0x88   : > { %902 = vmatprep.subr.bf16.mxu0 %v1201_v0 }
  0x89   : > { %925 = vmatpush3.bf16.msra.mxu1 %v924_v42 }
  0x8a   : > { %926 = vmatprep.subr.bf16.mxu1 %v1201_v0 }
  0x8b   : > { %904 = vmatpush3.bf16.msra.mxu0 %v903_v39 }
  0x8c   : > { %905 = vmatprep.subr.bf16.mxu0 %v1201_v0 }
  0x8d   : > { %928 = vmatpush3.bf16.msra.mxu1 %v927_v46 }
  0x8e   : > { %929 = vmatprep.subr.bf16.mxu1 %v1201_v0 }
  0x8f   : > { %907 = vmatpush3.bf16.msra.mxu0 %v906_v45 }
  0x91   : > { %931 = vmatpush3.bf16.msra.mxu1 %v930_v50 }
  0x92   : > { %847 = vmatmul.mubr.f32.vlgmr.msra.gmra.mrb[0].mxu0 %v397_v47 }
 0x165   : > { %v487_v52 = vpop.f32.mrb[0].mxu0 }
 0x166   : > { %v488_v53 = vadd.f32 %v771_v51, %v487_v52  ;;  %v848_v54 = vpop.f32.mrb[1].mxu0 }
 0x168   : > { %v491_v55 = vmax.f32 %v488_v53, 0.0 }
 0x16a   : > { %882 = vmatmul.mubr.f32.vlgmr.msra.gmra.mrb[0].mxu1 %v491_v55 }
 0x23d   : > { %v575_v57 = vpop.f32.mrb[0].mxu1 }
 0x23e   : > { %v592_v58 = vadd.f32 %v772_v56, %v575_v57  ;;  %v883_v59 = vpop.f32.mrb[1].mxu1 }
 0x240   : > { %v593_v60 = vadd.f32 %v592_v58, %v397_v47 }
 0x242   : > { %594 = vadd.xlane.f32.xlu0 %v593_v60 }
 0x2cf   : > { %v595_v61 = vpop.xlane.xlu0 %594 }
 0x2d0   : > { %v596_v62 = vmul.f32 0.03125, %v595_v61 }
 0x2d2   : > { %v597_v0 = vsub.f32 %v593_v60, %v596_v62 }
 0x2d4   : > { %v605_v1 = vmul.f32 %v773_v63, %v597_v0 }
 0x2d6   : > { %v606_v2 = vmul.f32 %v605_v1, %v605_v1 }
 0x2d8   : > { %607 = vadd.xlane.f32.xlu0 %v606_v2 }
 0x365   : > { %v608_v3 = vpop.xlane.xlu0 %607 }
 0x366   : > { %v609_v4 = vmul.f32 0.03125, %v608_v3 }
 0x368   : > { %v610_v5 = vadd.f32 1e-05, %v609_v4 }
 0x36a   : > { %1020 = vrsqrt.f32 %v610_v5 }
 0x374   : > { %v1021_v6 = vpop.eup %1020 }
 0x375   : > { %v612_v8 = vmul.f32 %v1021_v6, %v605_v1 }
 0x377   : > { %v620_v10 = vmul.f32 %v774_v7, %v612_v8 }
 0x379   : > { %v628_v11 = vadd.f32 %v775_v9, %v620_v10 }
 0x37b   : > { %629 = vst [vmem:[%s387_s12] sm:$0xff] %v628_v11 }
 0x37c   : > { %1121 = shalt.err (!%p1118_p11)
}
 0x37d   : > { %s1122_s25 = scalar_lea.hbm %s1489_s21, 128  ;;  %s1126_s26 = scalar_lea.hbm %s1567_s17, 256 }
 0x37e   : > { %p1123_p0 = scmp.ne.s32.totalorder %s1489_s21, %s1122_s25  ;;  %p1127_p6 = scmp.lt.u32.totalorder %s1489_s21, %s1567_s17 }
 0x37f   : > { %p1128_p7 = scmp.lt.u32.totalorder %s1126_s26, %s1122_s25  ;;  %p1130_p8 = scmp.lt.u32.totalorder %s1122_s25, %s1489_s21 }
 0x380   : > { %p1124_p4 = pnand %p1123_p0, %p1568_p12 }
 0x381   : > { %p1129_p2 = por %p1128_p7, %p1127_p6 }
 0x382   : > { %p1125_p13 = pneg %p1124_p4 }
 0x383   : > { %p1131_p1 = por %p1130_p8, %p1129_p2 }
 0x385   : > { %p1132_p10 = pnand %p1131_p1, %p1125_p13 }
 0x387   : > { %1135 = shalt.err (!%p1132_p10)
}
 0x388   : > { %942 = dma.vmem_to_hbm [thread:$0]  (%p1568_p12), %s1491_s18, 128, %s1489_s21, %s631_s19  }
 0x389 PF: > { %s1569_s13 = sld [smem:[#allocation13_spill]]  ;;  %s1570_s15 = sld [smem:[#allocation14_spill]] }
 0x38a   : > { %p1572_p5 = scmp.ge.s32.totalorder %s1194_s10, 2 }
 0x38f   : > { %s656_s8 = sand.u32 1, %s1569_s13   ;;  %p1571_p3 = scmp.ne.s32.totalorder %s1570_s15, 0 }
 0x390   : > { %s657_s30 = scalar_lea.sflag [#allocation5], %s656_s8 }
 0x391   : > { %p956_p9 = pnand %p1572_p5, %p1571_p3 }
 0x393   : > { %1169 = dma.done.wait (!%p956_p9), %s657_s30, 128  }
 0x394   : > { %1171 = vsyncadd (!%p956_p9), %s657_s30, 4294967168  ;;  %s25_s10 = sadd.s32 1, %s1194_s10   ;;  %s1573_s27 = smov %s1178_s28 }
 0x395   : > { %p22_p11 = scmp.ge.s32.totalorder %s25_s10, 4   ;;  %s1574_s28 = smov %s1182_s29 }
 0x396   : > { %s1575_s29 = smov %s1392_s24  ;;  %s1576_s30 = smov %s1190_s9 }
 0x397   : > { %s1577_s9 = smov %s1579_s16  ;;  %24 = sbr.rel (!%p22_p11) target bundleno = 9 (0x9), region = 118 }
 0x39e   :  { %662 = vsyncpa [#allocation4], 1 }
 0x39f   :  { %664 = vsyncpa [#allocation4 + $0x1], 1 }
 0x3a0   :  { %665 = vsyncpa [#allocation7], 1 }
 0x3a1   :  { %666 = vsyncpa [#allocation5], 1 }
 0x3a2   :  { %668 = vsyncpa [#allocation5 + $0x1], 1 }

// kernel: tpu_custom_call.1
= control target key start
LH: loop header
LB: loop body
LE: loop exit
PB: predicated region body
PF: predicated region fallthrough
CT: control target
= control target key end

     0   :  { %s1538_s0 = inlined_call_operand.hbm [shape: f32[16,128], index: 0, kind: input, shape index: {}]   ;;  %s1539_s1 = inlined_call_operand.hbm [shape: f32[128,128], index: 1, kind: input, shape index: {}]   ;;  %s1540_s2 = inlined_call_operand.vmem [shape: f32[1,128], index: 2, kind: input, shape index: {}]   ;;  %s1541_s3 = inlined_call_operand.hbm [shape: f32[128,128], index: 3, kind: input, shape index: {}]   ;;  %s1542_s4 = inlined_call_operand.vmem [shape: f32[1,128], index: 4, kind: input, shape index: {}]   ;;  %s1543_s5 = inlined_call_operand.vmem [shape: f32[1,128], index: 5, kind: input, shape index: {}]   ;;  %s1544_s6 = inlined_call_operand.vmem [shape: f32[1,128], index: 6, kind: input, shape index: {}]   ;;  %s1545_s7 = inlined_call_operand.vmem [shape: f32[1,128], index: 7, kind: input, shape index: {}]   ;;  %s1546_s8 = inlined_call_operand.hbm [shape: f32[16,128], index: 8, kind: output, shape index: {}]  }
   0x1   :  { %1554 = sst [smem:[#allocation15_spill]] %s1546_s8 }
   0x2   :  { %13 = vsyncpa [#allocation4], 0 }
   0x3   :  { %15 = vsyncpa [#allocation4 + $0x1], 0 }
   0x4   :  { %16 = vsyncpa [#allocation7], 0 }
   0x5   :  { %17 = vsyncpa [#allocation5], 0 }
   0x6   :  { %19 = vsyncpa [#allocation5 + $0x1], 0  ;;  %s1250_s27 = smov 0   ;;  %s1252_s28 = smov 0  }
   0x7   :  { %s1254_s29 = smov 0   ;;  %s1256_s30 = smov 0  }
   0x8   :  { %s1258_s9 = smov 0   ;;  %s1260_s10 = smov 0  }
   0x9 LB: > { %1555 = sst [smem:[#allocation13_spill]] %s1174_s27  ;;  %s757_s11 = sadd.s32 4294967295, %s1194_s10   ;;  %s1194_s10 = sphi %s1260_s10, %s25_s10   ;;  %s1190_s9 = sphi %s1258_s9, %s1577_s9   ;;  %s1186_s30 = sphi %s1256_s30, %s1576_s30   ;;  %s1182_s29 = sphi %s1254_s29, %s1575_s29   ;;  %s1178_s28 = sphi %s1252_s28, %s1574_s28   ;;  %s1174_s27 = sphi %s1250_s27, %s1573_s27  }
   0xa   : > { %s758_s12 = sadd.s32 4294967294, %s1194_s10   ;;  %p57_p0 = scmp.ne.s32.totalorder %s1178_s28, %s1174_s27 }
   0xb   : > { %p1284_p1 = scmp.eq.s32.totalorder %s757_s11, 0  ;;  %p1288_p2 = scmp.eq.s32.totalorder %s757_s11, 1 }
   0xc   : > { %p249_p3 = scmp.eq.s32.totalorder %s758_s12, 1  ;;  %p759_p5 = scmp.ge.s32.totalorder %s1194_s10, 1 }
   0xd   : > { %s1556_s13 = scalar_select %p1284_p1, 1, 0 }
   0xe   : > { %p1294_p4 = por %p1284_p1, %p57_p0  ;;  %p1299_p6 = por %p249_p3, %p57_p0 }
   0xf   : > { %p256_p7 = scmp.lt.s32.totalorder %s1194_s10, 3  ;;  %s1196_s18 = smov [#allocation6]  }
  0x10   : > { %s1558_s15 = scalar_select %p1294_p4, 1, 0 }
  0x11   : > { %s1559_s16 = scalar_select %p1299_p6, 1, 0 }
  0x12   : > { %p1304_p8 = pnand %p759_p5, %p256_p7  ;;  %s270_s19 = sshll.u32 %s1196_s18, 4  ;;  %s1308_s19 = int_to_ptr.vmem [resolvable:$true] %s270_s19 }
  0x13   : > { %1560 = sst [smem:[#allocation14_spill]] %s1559_s16  ;;  %s1197_s21 = smov [#allocation8]  }
  0x14   : > { %p944_p9 = pneg %p1304_p8  ;;  %s292_s22 = sshll.u32 %s1197_s21, 4  ;;  %s1319_s22 = int_to_ptr.vmem [resolvable:$true] %s292_s22 }
  0x15   : > { %s1022_s25 = scalar_lea.hbm %s1539_s1, 2048 }
  0x16   : > { %p1315_p11 = pnand %p944_p9, %p1284_p1  ;;  %p1023_p12 = scmp.ne.s32.totalorder %s1539_s1, %s1022_s25 }
  0x17   : > { %p1029_p5 = scmp.lt.u32.totalorder %s1022_s25, %s1539_s1 }
  0x18   : > { %p1024_p13 = pneg %p1315_p11 }
  0x1a   : > { %p1025_p0 = pnand %p1024_p13, %p1023_p12 }
  0x1c   : > { %p1026_p3 = pneg %p1025_p0 }
  0x1e   : > { %p1031_p7 = pnand %p1029_p5, %p1026_p3 }
  0x20   : > { %1034 = shalt.err (!%p1031_p7)
}
  0x21   : > { %s1035_s21 = scalar_lea.vmem %s1308_s19, 2048  ;;  %p1043_p1 = scmp.lt.s32.totalorder %s1308_s19, %s1308_s19 }
  0x22   : > { %p1036_p9 = scmp.ne.s32.totalorder %s1308_s19, %s1035_s21  ;;  %p1044_p12 = scmp.lt.s32.totalorder %s1035_s21, %s1035_s21 }
  0x24   : > { %p1038_p10 = pnand %p1036_p9, %p1024_p13  ;;  %p1045_p0 = por %p1044_p12, %p1043_p1 }
  0x26   : > { %p1039_p6 = pneg %p1038_p10 }
  0x28   : > { %p1046_p4 = pnand %p1045_p0, %p1039_p6 }
  0x2a   : > { %1049 = shalt.err (!%p1046_p4)
}
  0x2b   : > { %s1198_s23 = smov 128   ;;  %s1199_s24 = smov 8  }
  0x2c   : > { %947 = dma.hbm_to_vmem [thread:$0]  (!%p1315_p11), %s1539_s1, 2048, %s1308_s19, [#allocation7], %s1198_s23, %s1198_s23, %s1199_s24  }
  0x2d   : > { %s1050_s18 = scalar_lea.hbm %s1541_s3, 2048 }
  0x2e   : > { %p1051_p1 = scmp.ne.s32.totalorder %s1541_s3, %s1050_s18  ;;  %p1057_p10 = scmp.lt.u32.totalorder %s1050_s18, %s1541_s3 }
  0x30   : > { %p1053_p4 = pnand %p1051_p1, %p1024_p13 }
  0x32   : > { %p1054_p6 = pneg %p1053_p4 }
  0x34   : > { %p1059_p3 = pnand %p1057_p10, %p1054_p6 }
  0x36   : > { %1062 = shalt.err (!%p1059_p3)
}
  0x37   : > { %s1063_s19 = scalar_lea.vmem %s1319_s22, 2048  ;;  %p1071_p12 = scmp.lt.s32.totalorder %s1319_s22, %s1319_s22 }
  0x38   : > { %p1064_p5 = scmp.ne.s32.totalorder %s1319_s22, %s1063_s19  ;;  %p1072_p0 = scmp.lt.s32.totalorder %s1063_s19, %s1063_s19 }
  0x3a   : > { %p1066_p7 = pnand %p1064_p5, %p1024_p13  ;;  %p1073_p1 = por %p1072_p0, %p1071_p12 }
  0x3c   : > { %p1067_p9 = pneg %p1066_p7 }
  0x3e   : > { %p1074_p4 = pnand %p1073_p1, %p1067_p9 }
  0x40   : > { %1077 = shalt.err (!%p1074_p4)
}
  0x41   : > { %950 = dma.hbm_to_vmem [thread:$0]  (!%p1315_p11), %s1541_s3, 2048, %s1319_s22, [#allocation7], %s1198_s23, %s1198_s23, %s1199_s24  }
  0x42   : > { %s37_s16 = sadd.s32 1, %s1190_s9  ;;  %s44_s25 = sadd.s32 1, %s1182_s29 }
  0x43   : > { %p39_p13 = scmp.ge.s32.totalorder %s37_s16, 2  ;;  %p51_p6 = scmp.ne.s32.totalorder %s1182_s29, %s1178_s28 }
  0x44   : > { %p52_p10 = scmp.eq.s32.totalorder %s1194_s10, 0  ;;  %p961_p3 = scmp.lt.s32.totalorder %s1194_s10, 2 }
  0x45   : > { %s1579_s16 = smov (%p39_p13, %s37_s16), 0  ;;  %p1383_p7 = por %p1288_p2, %p51_p6 }
  0x46   : > { %p53_p5 = por %p52_p10, %p51_p6  ;;  %s41_s26 = ssub.s32 %s1190_s9, %s1579_s16 }
  0x47   : > { %s1563_s20 = scalar_select %p1383_p7, 1, 0 }
  0x48   : > { %s318_s11 = sand.u32 1, %s1182_s29   ;;  %p42_p9 = scmp.eq.s32.totalorder %s41_s26, 0 }
  0x49   : > { %s764_s22 = sshll.u32 %s318_s11, 3  ;;  %s765_s23 = sshll.u32 %s1190_s9, 7 }
  0x4a   : > { %s1392_s24 = scalar_select %p42_p9, %s1182_s29, %s44_s25  }
  0x4b   : > { %s1397_s21 = scalar_lea.hbm %s1538_s0, %s765_s23  ;;  %s322_s14 = scalar_lea.vmem [#allocation3], %s764_s22 }
  0x4c   : > { %s329_s19 = sshll.u32 %s322_s14, 4  ;;  %p1401_p2 = pnand %p961_p3, %p53_p5  ;;  %s1405_s19 = int_to_ptr.vmem [resolvable:$true] %s329_s19 }
  0x4d   : > { %s319_s27 = scalar_lea.sflag [#allocation4], %s318_s11  ;;  %s1078_s25 = scalar_lea.hbm %s1397_s21, 128 }
  0x4e   : > { %p1079_p11 = scmp.ne.s32.totalorder %s1397_s21, %s1078_s25  ;;  %p1080_p12 = pneg %p1401_p2 }
  0x4f   : > { %s1083_s23 = scalar_lea.hbm %s1538_s0, 256  ;;  %p1084_p4 = scmp.lt.u32.totalorder %s1397_s21, %s1538_s0 }
  0x50   : > { %p1081_p0 = pnand %p1080_p12, %p1079_p11  ;;  %p1085_p13 = scmp.lt.u32.totalorder %s1083_s23, %s1078_s25 }
  0x51   : > { %p1087_p10 = scmp.lt.u32.totalorder %s1078_s25, %s1397_s21 }
  0x52   : > { %p1082_p1 = pneg %p1081_p0  ;;  %p1086_p6 = por %p1085_p13, %p1084_p4 }
  0x54   : > { %p1088_p3 = por %p1087_p10, %p1086_p6 }
  0x56   : > { %p1089_p5 = pnand %p1088_p3, %p1082_p1 }
  0x58   : > { %1092 = shalt.err (!%p1089_p5)
}
  0x59   : > { %s1093_s11 = scalar_lea.vmem %s1405_s19, 128  ;;  %s1200_s14 = smov [#allocation3]  }
  0x5a   : > { %p1094_p9 = scmp.ne.s32.totalorder %s1405_s19, %s1093_s11  ;;  %s1098_s26 = sshll.u32 %s1200_s14, 4  ;;  %s1099_s26 = int_to_ptr.vmem [resolvable:$false] %s1098_s26 }
  0x5b   : > { %s1100_s22 = scalar_lea.vmem %s1099_s26, 256  ;;  %p1101_p7 = scmp.lt.s32.totalorder %s1405_s19, %s1099_s26 }
  0x5c   : > { %p1096_p11 = pnand %p1094_p9, %p1080_p12  ;;  %p1102_p4 = scmp.lt.s32.totalorder %s1100_s22, %s1093_s11 }
  0x5e   : > { %p1097_p0 = pneg %p1096_p11  ;;  %p1103_p13 = por %p1102_p4, %p1101_p7 }
  0x60   : > { %p1104_p6 = pnand %p1103_p13, %p1097_p0 }
  0x62   : > { %1107 = shalt.err (!%p1104_p6)
}
  0x63   : > { %954 = dma.hbm_to_vmem [thread:$0]  (!%p1401_p2), %s1397_s21, 128, %s1405_s19, %s319_s27  }
  0x64   : > { %338 = sbr.rel (%p1304_p8) target bundleno = 905 (0x389), region = 52  ;;  %s1435_s25 = sand.u32 (!%p1304_p8), 1, %s1178_s28  }
  0x65   : > { %s767_s23 = sshll.u32 (!%p1304_p8), %s1435_s25, 3  ;;  %s341_s12 = scalar_lea.sflag (!%p1304_p8), [#allocation4], %s1435_s25 }
  0x66   : > { %s1441_s18 = scalar_lea.vmem (!%p1304_p8), [#allocation3], %s767_s23  ;;  %p1565_p7 = scmp.ne.s32.totalorder (!%p1304_p8), %s1558_s15, 0 }
  0x6b   : > { %1161 = dma.done.wait (%p1565_p7), %s341_s12, 128  }
  0x6c   : > { %1163 = vsyncadd (%p1565_p7), %s341_s12, 4294967168  ;;  %p1566_p2 = scmp.ne.s32.totalorder %s1556_s13, 0 }
  0x6e   : > { %1165 = dma.done.wait (%p1566_p2), [#allocation7], 4096  }
  0x6f   : > { %1167 = vsyncadd (%p1566_p2), [#allocation7], 4294963200  ;;  %v1201_v0 = vmov 0.0|0.0   ;;  %vm1202_vm0 = vmmov 0   ;;  %v1203_v1 = vmov 0.0   ;;  %v398_v2 = vld [vmem:[#allocation6] sm:$0xff] }
  0x70   : > { %884 = vmatprep.subr.bf16.mxu0 %v1201_v0  ;;  %846 = vmatprep.mubr.msk.f32.mxu0 %vm1202_vm0, %v1203_v1  ;;  %v399_v3 = vld [vmem:[#allocation6 + $0x8] sm:$0xff]  ;;  %v400_v4 = vld [vmem:[#allocation6 + $0x10] sm:$0xff]  ;;  %v401_v6 = vld [vmem:[#allocation6 + $0x18] sm:$0xff]  ;;  %s777_s22 = sshll.u32 %s1186_s30, 7  ;;  %s387_s12 = scalar_lea.vmem [#allocation9], %s767_s23 }
  0x71   : > { %908 = vmatprep.subr.bf16.mxu1 %v1201_v0  ;;  %881 = vmatprep.mubr.msk.f32.mxu1 %vm1202_vm0, %v1203_v1  ;;  %v885_v5 = vpack.c.bf16 %v399_v3, %v398_v2  ;;  %v888_v7 = vpack.c.bf16 %v401_v6, %v400_v4  ;;  %v402_v8 = vld [vmem:[#allocation6 + $0x20] sm:$0xff]  ;;  %v403_v9 = vld [vmem:[#allocation6 + $0x28] sm:$0xff]  ;;  %v495_v12 = vld [vmem:[#allocation8 + $0x10] sm:$0xff]  ;;  %s1567_s17 = sld [smem:[#allocation15_spill]]  ;;  %s631_s19 = scalar_lea.sflag [#allocation5], %s1435_s25 }
  0x72   : > { %v493_v10 = vld [vmem:[#allocation8] sm:$0xff]  ;;  %v494_v11 = vld [vmem:[#allocation8 + $0x8] sm:$0xff]  ;;  %v496_v13 = vld [vmem:[#allocation8 + $0x18] sm:$0xff]  ;;  %v891_v14 = vpack.c.bf16 %v403_v9, %v402_v8  ;;  %p1568_p12 = scmp.ne.s32.totalorder %s1563_s20, 0  ;;  %s1204_s30 = smov [#allocation9]  }
  0x73   : > { %886 = vmatpush3.bf16.msra.mxu0 %v885_v5  ;;  %v909_v15 = vpack.c.bf16 %v494_v11, %v493_v10  ;;  %v404_v16 = vld [vmem:[#allocation6 + $0x30] sm:$0xff]  ;;  %v405_v17 = vld [vmem:[#allocation6 + $0x38] sm:$0xff]  ;;  %v912_v18 = vpack.c.bf16 %v496_v13, %v495_v12  ;;  %v497_v19 = vld [vmem:[#allocation8 + $0x20] sm:$0xff]  ;;  %s1112_s23 = sshll.u32 %s1204_s30, 4  ;;  %s1113_s23 = int_to_ptr.vmem [resolvable:$false] %s1112_s23 }
  0x74   : > { %887 = vmatprep.subr.bf16.mxu0 %v1201_v0  ;;  %v498_v20 = vld [vmem:[#allocation8 + $0x28] sm:$0xff]  ;;  %v894_v21 = vpack.c.bf16 %v405_v17, %v404_v16  ;;  %v406_v22 = vld [vmem:[#allocation6 + $0x40] sm:$0xff]  ;;  %v499_v25 = vld [vmem:[#allocation8 + $0x30] sm:$0xff]  ;;  %s1114_s27 = scalar_lea.vmem %s1113_s23, 256 }
  0x75   : > { %910 = vmatpush3.bf16.msra.mxu1 %v909_v15  ;;  %v407_v23 = vld [vmem:[#allocation6 + $0x48] sm:$0xff]  ;;  %v915_v24 = vpack.c.bf16 %v498_v20, %v497_v19  ;;  %v500_v26 = vld [vmem:[#allocation8 + $0x38] sm:$0xff]  ;;  %v408_v28 = vld [vmem:[#allocation6 + $0x50] sm:$0xff] }
  0x76   : > { %911 = vmatprep.subr.bf16.mxu1 %v1201_v0  ;;  %v897_v27 = vpack.c.bf16 %v407_v23, %v406_v22  ;;  %v409_v29 = vld [vmem:[#allocation6 + $0x58] sm:$0xff]  ;;  %v918_v30 = vpack.c.bf16 %v500_v26, %v499_v25  ;;  %v501_v31 = vld [vmem:[#allocation8 + $0x40] sm:$0xff]  ;;  %v502_v32 = vld [vmem:[#allocation8 + $0x48] sm:$0xff] }
  0x77   : > { %889 = vmatpush3.bf16.msra.mxu0 %v888_v7  ;;  %v900_v33 = vpack.c.bf16 %v409_v29, %v408_v28  ;;  %v410_v34 = vld [vmem:[#allocation6 + $0x60] sm:$0xff]  ;;  %v411_v35 = vld [vmem:[#allocation6 + $0x68] sm:$0xff]  ;;  %v921_v36 = vpack.c.bf16 %v502_v32, %v501_v31  ;;  %v503_v37 = vld [vmem:[#allocation8 + $0x50] sm:$0xff]  ;;  %s1489_s21 = scalar_lea.hbm %s1567_s17, %s777_s22 }
  0x78   : > { %890 = vmatprep.subr.bf16.mxu0 %v1201_v0  ;;  %v504_v38 = vld [vmem:[#allocation8 + $0x58] sm:$0xff]  ;;  %v903_v39 = vpack.c.bf16 %v411_v35, %v410_v34  ;;  %v412_v40 = vld [vmem:[#allocation6 + $0x70] sm:$0xff]  ;;  %v505_v43 = vld [vmem:[#allocation8 + $0x60] sm:$0xff] }
  0x79   : > { %913 = vmatpush3.bf16.msra.mxu1 %v912_v18  ;;  %v413_v41 = vld [vmem:[#allocation6 + $0x78] sm:$0xff]  ;;  %v924_v42 = vpack.c.bf16 %v504_v38, %v503_v37  ;;  %v506_v44 = vld [vmem:[#allocation8 + $0x68] sm:$0xff]  ;;  %v507_v48 = vld [vmem:[#allocation8 + $0x70] sm:$0xff] }
  0x7a   : > { %914 = vmatprep.subr.bf16.mxu1 %v1201_v0  ;;  %v906_v45 = vpack.c.bf16 %v413_v41, %v412_v40  ;;  %v927_v46 = vpack.c.bf16 %v506_v44, %v505_v43  ;;  %v397_v47 = vld [vmem:[%s1441_s18] sm:$0xff]  ;;  %s644_s18 = sshll.u32 %s387_s12, 4  ;;  %s1491_s18 = int_to_ptr.vmem [resolvable:$true] %s644_s18 }
  0x7b   : > { %892 = vmatpush3.bf16.msra.mxu0 %v891_v14  ;;  %v508_v49 = vld [vmem:[#allocation8 + $0x78] sm:$0xff]  ;;  %v771_v51 = vld [vmem:[%s1540_s2] ss:$0 sm:$0xff]  ;;  %s1108_s8 = scalar_lea.vmem %s1491_s18, 128  ;;  %p1115_p3 = scmp.lt.s32.totalorder %s1491_s18, %s1113_s23 }
  0x7c   : > { %893 = vmatprep.subr.bf16.mxu0 %v1201_v0  ;;  %v930_v50 = vpack.c.bf16 %v508_v49, %v507_v48  ;;  %v772_v56 = vld [vmem:[%s1542_s4] ss:$0 sm:$0xff]  ;;  %p1109_p8 = scmp.ne.s32.totalorder %s1491_s18, %s1108_s8  ;;  %p1116_p5 = scmp.lt.s32.totalorder %s1114_s27, %s1108_s8 }
  0x7d   : > { %916 = vmatpush3.bf16.msra.mxu1 %v915_v24  ;;  %v773_v63 = vld [vmem:[%s1545_s7] ss:$0 sm:$0xff] }
  0x7e   : > { %917 = vmatprep.subr.bf16.mxu1 %v1201_v0  ;;  %v774_v7 = vld [vmem:[%s1543_s5] ss:$0 sm:$0xff]  ;;  %p1110_p1 = pnand %p1109_p8, %p1568_p12  ;;  %p1117_p9 = por %p1116_p5, %p1115_p3 }
  0x7f   : > { %895 = vmatpush3.bf16.msra.mxu0 %v894_v21  ;;  %v775_v9 = vld [vmem:[%s1544_s6] ss:$0 sm:$0xff] }
  0x80   : > { %896 = vmatprep.subr.bf16.mxu0 %v1201_v0  ;;  %p1111_p10 = pneg %p1110_p1 }
  0x81   : > { %919 = vmatpush3.bf16.msra.mxu1 %v918_v30 }
  0x82   : > { %920 = vmatprep.subr.bf16.mxu1 %v1201_v0  ;;  %p1118_p11 = pnand %p1117_p9, %p1111_p10 }
  0x83   : > { %898 = vmatpush3.bf16.msra.mxu0 %v897_v27 }
  0x84   : > { %899 = vmatprep.subr.bf16.mxu0 %v1201_v0 }
  0x85   : > { %922 = vmatpush3.bf16.msra.mxu1 %v921_v36 }
  0x86   : > { %923 = vmatprep.subr.bf16.mxu1 %v1201_v0 }
  0x87   : > { %901 = vmatpush3.bf16.msra.mxu0 %v900_v33 }
  0x88   : > { %902 = vmatprep.subr.bf16.mxu0 %v1201_v0 }
  0x89   : > { %925 = vmatpush3.bf16.msra.mxu1 %v924_v42 }
  0x8a   : > { %926 = vmatprep.subr.bf16.mxu1 %v1201_v0 }
  0x8b   : > { %904 = vmatpush3.bf16.msra.mxu0 %v903_v39 }
  0x8c   : > { %905 = vmatprep.subr.bf16.mxu0 %v1201_v0 }
  0x8d   : > { %928 = vmatpush3.bf16.msra.mxu1 %v927_v46 }
  0x8e   : > { %929 = vmatprep.subr.bf16.mxu1 %v1201_v0 }
  0x8f   : > { %907 = vmatpush3.bf16.msra.mxu0 %v906_v45 }
  0x91   : > { %931 = vmatpush3.bf16.msra.mxu1 %v930_v50 }
  0x92   : > { %847 = vmatmul.mubr.f32.vlgmr.msra.gmra.mrb[0].mxu0 %v397_v47 }
 0x165   : > { %v487_v52 = vpop.f32.mrb[0].mxu0 }
 0x166   : > { %v488_v53 = vadd.f32 %v771_v51, %v487_v52  ;;  %v848_v54 = vpop.f32.mrb[1].mxu0 }
 0x168   : > { %v491_v55 = vmax.f32 %v488_v53, 0.0 }
 0x16a   : > { %882 = vmatmul.mubr.f32.vlgmr.msra.gmra.mrb[0].mxu1 %v491_v55 }
 0x23d   : > { %v575_v57 = vpop.f32.mrb[0].mxu1 }
 0x23e   : > { %v592_v58 = vadd.f32 %v772_v56, %v575_v57  ;;  %v883_v59 = vpop.f32.mrb[1].mxu1 }
 0x240   : > { %v593_v60 = vadd.f32 %v592_v58, %v397_v47 }
 0x242   : > { %594 = vadd.xlane.f32.xlu0 %v593_v60 }
 0x2cf   : > { %v595_v61 = vpop.xlane.xlu0 %594 }
 0x2d0   : > { %v596_v62 = vmul.f32 0.03125, %v595_v61 }
 0x2d2   : > { %v597_v0 = vsub.f32 %v593_v60, %v596_v62 }
 0x2d4   : > { %v605_v1 = vmul.f32 %v773_v63, %v597_v0 }
 0x2d6   : > { %v606_v2 = vmul.f32 %v605_v1, %v605_v1 }
 0x2d8   : > { %607 = vadd.xlane.f32.xlu0 %v606_v2 }
 0x365   : > { %v608_v3 = vpop.xlane.xlu0 %607 }
 0x366   : > { %v609_v4 = vmul.f32 0.03125, %v608_v3 }
 0x368   : > { %v610_v5 = vadd.f32 1e-05, %v609_v4 }
 0x36a   : > { %1020 = vrsqrt.f32 %v610_v5 }
 0x374   : > { %v1021_v6 = vpop.eup %1020 }
 0x375   : > { %v612_v8 = vmul.f32 %v1021_v6, %v605_v1 }
 0x377   : > { %v620_v10 = vmul.f32 %v774_v7, %v612_v8 }
 0x379   : > { %v628_v11 = vadd.f32 %v775_v9, %v620_v10 }
 0x37b   : > { %629 = vst [vmem:[%s387_s12] sm:$0xff] %v628_v11 }
 0x37c   : > { %1121 = shalt.err (!%p1118_p11)
}
 0x37d   : > { %s1122_s25 = scalar_lea.hbm %s1489_s21, 128  ;;  %s1126_s26 = scalar_lea.hbm %s1567_s17, 256 }
 0x37e   : > { %p1123_p0 = scmp.ne.s32.totalorder %s1489_s21, %s1122_s25  ;;  %p1127_p6 = scmp.lt.u32.totalorder %s1489_s21, %s1567_s17 }
 0x37f   : > { %p1128_p7 = scmp.lt.u32.totalorder %s1126_s26, %s1122_s25  ;;  %p1130_p8 = scmp.lt.u32.totalorder %s1122_s25, %s1489_s21 }
 0x380   : > { %p1124_p4 = pnand %p1123_p0, %p1568_p12 }
 0x381   : > { %p1129_p2 = por %p1128_p7, %p1127_p6 }
 0x382   : > { %p1125_p13 = pneg %p1124_p4 }
 0x383   : > { %p1131_p1 = por %p1130_p8, %p1129_p2 }
 0x385   : > { %p1132_p10 = pnand %p1131_p1, %p1125_p13 }
 0x387   : > { %1135 = shalt.err (!%p1132_p10)
}
 0x388   : > { %942 = dma.vmem_to_hbm [thread:$0]  (%p1568_p12), %s1491_s18, 128, %s1489_s21, %s631_s19  }
 0x389 PF: > { %s1569_s13 = sld [smem:[#allocation13_spill]]  ;;  %s1570_s15 = sld [smem:[#allocation14_spill]] }
 0x38a   : > { %p1572_p5 = scmp.ge.s32.totalorder %s1194_s10, 2 }
 0x38f   : > { %s656_s8 = sand.u32 1, %s1569_s13   ;;  %p1571_p3 = scmp.ne.s32.totalorder %s1570_s15, 0 }
 0x390   : > { %s657_s30 = scalar_lea.sflag [#allocation5], %s656_s8 }
 0x391   : > { %p956_p9 = pnand %p1572_p5, %p1571_p3 }
 0x393   : > { %1169 = dma.done.wait (!%p956_p9), %s657_s30, 128  }
 0x394   : > { %1171 = vsyncadd (!%p956_p9), %s657_s30, 4294967168  ;;  %s25_s10 = sadd.s32 1, %s1194_s10   ;;  %s1573_s27 = smov %s1178_s28 }
 0x395   : > { %p22_p11 = scmp.ge.s32.totalorder %s25_s10, 4   ;;  %s1574_s28 = smov %s1182_s29 }
 0x396   : > { %s1575_s29 = smov %s1392_s24  ;;  %s1576_s30 = smov %s1190_s9 }
 0x397   : > { %s1577_s9 = smov %s1579_s16  ;;  %24 = sbr.rel (!%p22_p11) target bundleno = 9 (0x9), region = 118 }
 0x39e   :  { %662 = vsyncpa [#allocation4], 1 }
 0x39f   :  { %664 = vsyncpa [#allocation4 + $0x1], 1 }
 0x3a0   :  { %665 = vsyncpa [#allocation7], 1 }
 0x3a1   :  { %666 = vsyncpa [#allocation5], 1 }
 0x3a2   :  { %668 = vsyncpa [#allocation5 + $0x1], 1 }

</bundles_post_ra>
